<compile_context>
chip_gen: v7x
topology: tpu7x:2x2x1
jax: 0.10.0
libtpu: 0.0.40
codegen_flags: <defaults>
</compile_context>

<pallas_src>
import functools

import jax
import jax.numpy as jnp
from jax.experimental import pallas as pl
from jax.experimental.pallas import tpu as pltpu


_DEFAULT_VMEM_BYTES = 64 * 1024 * 1024  # v7x per-TensorCore VMEM (smallest across gens)


def _vmem_capacity_bytes():
    try:
        return int(pltpu.get_tpu_info().vmem_capacity_bytes)
    except Exception:
        return _DEFAULT_VMEM_BYTES


def _lane_dense_view(S, D):
    """Per-batch 2-D view (R, C) of the (S, D) slab with a lane-dense last dim."""
    N = S * D
    if D % 128 == 0:
        return S, D            # already lane-dense, keep wide lanes
    if N % 128 == 0:
        return N // 128, 128   # elementwise over S*D -> flatten to 128-wide lanes
    return S, D                # tiny / odd shapes: full-block fallback (still correct)


def _pick_rows(R, bytes_per_row, target_bytes, pack=8):
    """Rows per tile/chunk: divides R, and is a multiple of `pack`/8 — or R itself."""
    max_rows = max(8, int(target_bytes) // max(int(bytes_per_row), 1))
    if R <= max_rows:
        return R
    for step in (pack, 8):
        best = 0
        for d in range(step, min(R, max_rows) + 1, step):
            if R % d == 0 and d > best:
                best = d
        if best:
            return best
    for d in range(8, R + 1, 8):       # smallest sublane-aligned divisor (stays legal)
        if R % d == 0:
            return d
    return R                           # awkward/prime row counts: full dim is always legal


# ---------------- single-pass (resident per-batch slab), chunked in-kernel ----------------

def _rmsnorm_fused_kernel(x_ref, scale_ref, o_ref, *, inv_n, chunk):
    R = x_ref.shape[0]
    n_chunks = R // chunk

    if n_chunks == 1:
        # Small slab: static full-block path (temporaries == slab, already gated).
        x = x_ref[...].astype(jnp.float32)
        row_sq = jnp.sum(x * x, axis=-1, keepdims=True)                    # (R, 1)
        inv_rms = jax.lax.rsqrt(jnp.sum(row_sq, axis=0, keepdims=True) * inv_n)
        o_ref[...] = (scale_ref[...].astype(jnp.float32) * x * inv_rms).astype(o_ref.dtype)
        return

    # Chunked sum-of-squares over the resident slab (caps f32 temporaries at chunk size).
    def sq_body(i, acc):
        start = pl.multiple_of(i * chunk, chunk)
        xc = x_ref[pl.ds(start, chunk), :].astype(jnp.float32)
        row_sq = jnp.sum(xc * xc, axis=-1, keepdims=True)                  # (chunk, 1)
        return acc + jnp.sum(row_sq, axis=0, keepdims=True)                # (1, 1)

    sumsq = jax.lax.fori_loop(0, n_chunks, sq_body, jnp.zeros((1, 1), jnp.float32))
    inv_rms = jax.lax.rsqrt(sumsq * inv_n)                                 # (1, 1)

    # Chunked normalize from the already-resident input buffer.
    def norm_body(i, carry):
        start = pl.multiple_of(i * chunk, chunk)
        idx = pl.ds(start, chunk)
        xc = x_ref[idx, :].astype(jnp.float32)
        sc = scale_ref[idx, :].astype(jnp.float32)
        o_ref[idx, :] = (sc * xc * inv_rms).astype(o_ref.dtype)
        return carry

    jax.lax.fori_loop(0, n_chunks, norm_body, 0)


# ---------------- two-pass (row-tiled) path ----------------

def _sumsq_kernel(x_ref, inv_ref, acc_ref, *, inv_n):
    # grid = (B, n_rt); row axis last and 'arbitrary'; acc_ref: (1,1) f32 scratch.
    r = pl.program_id(1)

    @pl.when(r == 0)
    def _():
        acc_ref[...] = jnp.zeros_like(acc_ref)

    x = x_ref[...].astype(jnp.float32)
    row_sq = jnp.sum(x * x, axis=-1, keepdims=True)                        # (rt, 1)
    acc_ref[...] += jnp.sum(row_sq, axis=0, keepdims=True)                 # (1, 1)

    @pl.when(r == pl.num_programs(1) - 1)
    def _():
        inv_ref[...] = jax.lax.rsqrt(acc_ref[...] * inv_n)                 # 1 / ff_rms


def _normalize_kernel(inv_smem_ref, x_ref, scale_ref, o_ref):
    # grid = (n_rt, B); inv_smem_ref: (B,) f32 in SMEM via scalar prefetch.
    b = pl.program_id(1)
    inv = inv_smem_ref[b]
    x = x_ref[...].astype(jnp.float32)
    s = scale_ref[...].astype(jnp.float32)
    o_ref[...] = (s * x * inv).astype(o_ref.dtype)


def rmsnorm(x, scale, *, force_two_pass=False, row_tile=None, chunk_rows=None):
    """RMSNorm matching the PyTorch module.

    x: (B, S, D); scale: (layer_seq, D) with layer_seq >= S. Returns (B, S, D).
    """
    B, S, D = x.shape
    N = S * D
    R, C = _lane_dense_view(S, D)

    itemsize = jnp.dtype(x.dtype).itemsize
    pack = {4: 8, 2: 16, 1: 32}.get(itemsize, 8)
    cap = _vmem_capacity_bytes()

    # glue matching `self.scale[:x.shape[1], :]`; keep x's dtype (cast to f32 in-kernel).
    scale_v = scale[:S, :].astype(x.dtype).reshape(R, C)
    x_v = x.reshape(B, R, C)

    # ---- fused single-pass path: per-batch slab resident, ~2*N HBM traffic ----
    if chunk_rows is not None:
        chunk = int(chunk_rows)
        assert R % chunk == 0 and (chunk % 8 == 0 or chunk == R), "bad chunk_rows"
    else:
        chunk = _pick_rows(R, C * 4, 1 << 20, pack=8)      # ~1 MiB of f32 temporaries
    fused_need = (4 * R * C * itemsize                      # x (2 bufs) + out (2 bufs)
                  + 1 * R * C * itemsize                    # scale: resident, Buffered(1)
                  + 4 * chunk * C * 4                       # in-kernel f32 chunk temporaries
                  + (2 << 20))
    # B >= 2 keeps both v7x TensorCores fed on the batch-parallel grid.
    use_fused = (not force_two_pass) and B >= 2 and fused_need <= int(0.7 * cap)

    if use_fused:
        fused_vmem = int(min(cap, max(fused_need, 32 << 20)))
        out = pl.pallas_call(
            functools.partial(_rmsnorm_fused_kernel, inv_n=1.0 / N, chunk=chunk),
            out_shape=jax.ShapeDtypeStruct((B, R, C), x.dtype),
            grid_spec=pltpu.PrefetchScalarGridSpec(
                num_scalar_prefetch=0,
                grid=(B,),
                in_specs=[
                    pl.BlockSpec((pl.Squeezed(), R, C), lambda b: (b, 0, 0)),
                    # constant block index -> never re-fetched; single-buffer it
                    pl.BlockSpec((R, C), lambda b: (0, 0),
                                 pipeline_mode=pl.Buffered(1)),
                ],
                out_specs=pl.BlockSpec((pl.Squeezed(), R, C), lambda b: (b, 0, 0)),
            ),
            compiler_params=pltpu.CompilerParams(
                dimension_semantics=("parallel",),
                vmem_limit_bytes=fused_vmem,
            ),
            cost_estimate=pl.CostEstimate(
                flops=4 * B * N, transcendentals=B,
                bytes_accessed=int(2 * B * N * itemsize + N * itemsize),
            ),
        )(x_v, scale_v)
        return out.reshape(B, S, D)

    # ---- two-pass row-tiled path (3*N traffic; huge slabs or B < 2) ----
    if row_tile is not None:
        rt = int(row_tile)
        assert R % rt == 0 and (rt % 8 == 0 or rt == R), "bad row_tile"
    else:
        rt = _pick_rows(R, C * itemsize, 2 << 20, pack=pack)   # ~2 MiB x-tile
    n_rt = R // rt
    pass_need = rt * C * (6 * itemsize + 4 * 4) + (2 << 20)
    two_pass_vmem = int(min(cap, max(pass_need, 32 << 20)))

    # Pass 1: per-batch sum of squares folded into the kernel; emits inv_rms directly.
    inv_rms = pl.pallas_call(
        functools.partial(_sumsq_kernel, inv_n=1.0 / N),
        out_shape=jax.ShapeDtypeStruct((B, 1, 1), jnp.float32),
        grid_spec=pltpu.PrefetchScalarGridSpec(
            num_scalar_prefetch=0,
            grid=(B, n_rt),
            in_specs=[pl.BlockSpec((pl.Squeezed(), rt, C), lambda b, r: (b, r, 0))],
            out_specs=pl.BlockSpec((pl.Squeezed(), 1, 1), lambda b, r: (b, 0, 0)),
            scratch_shapes=[pltpu.VMEM((1, 1), jnp.float32)],
        ),
        compiler_params=pltpu.CompilerParams(
            dimension_semantics=("parallel", "arbitrary"),
            vmem_limit_bytes=two_pass_vmem,
        ),
        cost_estimate=pl.CostEstimate(
            flops=2 * B * N, transcendentals=B,
            bytes_accessed=int(B * N * itemsize + B * 4),
        ),
    )(x_v)

    inv_flat = inv_rms.reshape(B)   # (B,) f32, scalar-prefetched into SMEM by pass 2

    # Pass 2: normalize. Batch is the innermost grid axis so the scale tile index
    # (r, 0) stays constant across consecutive steps -> scale read from HBM once.
    out = pl.pallas_call(
        _normalize_kernel,
        out_shape=jax.ShapeDtypeStruct((B, R, C), x.dtype),
        grid_spec=pltpu.PrefetchScalarGridSpec(
            num_scalar_prefetch=1,                          # inv_flat -> SMEM
            grid=(n_rt, B),
            in_specs=[
                pl.BlockSpec((pl.Squeezed(), rt, C), lambda r, b, inv: (b, r, 0)),
                pl.BlockSpec((rt, C), lambda r, b, inv: (r, 0)),
            ],
            out_specs=pl.BlockSpec((pl.Squeezed(), rt, C), lambda r, b, inv: (b, r, 0)),
        ),
        compiler_params=pltpu.CompilerParams(
            dimension_semantics=("parallel", "parallel"),
            vmem_limit_bytes=two_pass_vmem,
        ),
        cost_estimate=pl.CostEstimate(
            flops=2 * B * N, transcendentals=0,
            bytes_accessed=int(2 * B * N * itemsize + N * itemsize + B * 4),
        ),
    )(inv_flat, x_v, scale_v)
    return out.reshape(B, S, D)


def rmsnorm_ref(x, scale):
    B, S, D = x.shape
    xf = x.astype(jnp.float32)
    ff_rms = jnp.linalg.norm(xf.reshape(B, -1), axis=-1) * (S * D) ** (-0.5)
    raw = xf / ff_rms[:, None, None]
    return (scale[:S, :].astype(jnp.float32)[None] * raw).astype(x.dtype)


if __name__ == "__main__":
    key = jax.random.PRNGKey(0)
    k1, k2, k3 = jax.random.split(key, 3)

    # 1) Small shape implied by the module: (batch, seq_len, d_model) = (2, 8, 32).
    B, S, D = 2, 8, 32
    layer_seq = 16
    x = jax.random.normal(k1, (B, S, D), dtype=jnp.float32)
    scale = jnp.ones((layer_seq, D), dtype=jnp.float32)     # torch.ones init
    out = jax.block_until_ready(rmsnorm(x, scale))
    ref = rmsnorm_ref(x, scale)
    assert out.shape == (B, S, D)
    assert jnp.allclose(out, ref, atol=1e-5, rtol=1e-5)

    # 2) Fused path with the in-kernel chunked loops (forced small chunk).
    B1, S1, D1 = 2, 32, 128
    x1 = jax.random.normal(k2, (B1, S1, D1), dtype=jnp.float32)
    scale1 = jnp.ones((S1, D1), dtype=jnp.float32)
    out1 = jax.block_until_ready(rmsnorm(x1, scale1, chunk_rows=8))
    ref1 = rmsnorm_ref(x1, scale1)
    assert jnp.allclose(out1, ref1, atol=1e-5, rtol=1e-5)

    # 3) Row-tiled two-pass path (huge-slab / B<2 fallback), forced at a small shape.
    B2, S2, D2 = 2, 256, 256
    x2 = jax.random.normal(k3, (B2, S2, D2), dtype=jnp.float32)
    scale2 = jnp.ones((S2, D2), dtype=jnp.float32)
    out2 = jax.block_until_ready(rmsnorm(x2, scale2, force_two_pass=True, row_tile=128))
    ref2 = rmsnorm_ref(x2, scale2)
    assert jnp.allclose(out2, ref2, atol=1e-4, rtol=1e-4)

    print("KERNEL_OK")
</pallas_src>

<mosaic_0001>
module attributes {stable_mosaic.version = 11 : i64} {
  func.func @_rmsnorm_fused_kernel(%arg0: i32, %arg1: memref<1x2x128xf32, #tpu.memory_space<vmem>>, %arg2: memref<2x128xf32, #tpu.memory_space<vmem>>, %arg3: memref<1x2x128xf32, #tpu.memory_space<vmem>>) attributes {dimension_semantics = [#tpu.dimension_semantics<parallel>], iteration_bounds = array<i64: 2>, scalar_prefetch = 0 : i64, scratch_operands = 0 : i64, tpu.core_type = #tpu.core_type<tc>, window_params = [{transform_indices = @transform_0, window_bounds = array<i64: 1, 2, 128>}, {pipeline_mode = #tpu.pipeline_mode<synchronous>, transform_indices = @transform_1, window_bounds = array<i64: 2, 128>}, {transform_indices = @transform_2, window_bounds = array<i64: 1, 2, 128>}]} {
    %c0 = arith.constant 0 : index
    %c0_0 = arith.constant 0 : index
    %c0_1 = arith.constant 0 : index
    %0 = vector.load %arg1[%c0, %c0_0, %c0_1] : memref<1x2x128xf32, #tpu.memory_space<vmem>>, vector<1x2x128xf32>
    %1 = vector.shape_cast %0 : vector<1x2x128xf32> to vector<2x128xf32>
    %2 = arith.mulf %1, %1 : vector<2x128xf32>
    %cst = arith.constant dense<0.000000e+00> : vector<2xf32>
    %3 = vector.multi_reduction <add>, %2, %cst [1] : vector<2x128xf32> to vector<2xf32>
    %4 = vector.shape_cast %3 : vector<2xf32> to vector<2x1xf32>
    %cst_2 = arith.constant dense<0.000000e+00> : vector<1xf32>
    %5 = vector.multi_reduction <add>, %4, %cst_2 [0] : vector<2x1xf32> to vector<1xf32>
    %6 = vector.shape_cast %5 : vector<1xf32> to vector<1x1xf32>
    %cst_3 = arith.constant 3.906250e-03 : f32
    %7 = vector.broadcast %cst_3 : f32 to vector<1x1xf32>
    %8 = arith.mulf %6, %7 : vector<1x1xf32>
    %9 = math.rsqrt %8 : vector<1x1xf32>
    %c0_4 = arith.constant 0 : index
    %c0_5 = arith.constant 0 : index
    %10 = vector.load %arg2[%c0_4, %c0_5] : memref<2x128xf32, #tpu.memory_space<vmem>>, vector<2x128xf32>
    %11 = arith.mulf %10, %1 : vector<2x128xf32>
    %12 = vector.broadcast %9 : vector<1x1xf32> to vector<2x128xf32>
    %13 = arith.mulf %11, %12 : vector<2x128xf32>
    %c0_6 = arith.constant 0 : index
    %c0_7 = arith.constant 0 : index
    %c0_8 = arith.constant 0 : index
    %14 = vector.load %arg3[%c0_6, %c0_7, %c0_8] : memref<1x2x128xf32, #tpu.memory_space<vmem>>, vector<1x2x128xf32>
    %15 = vector.shape_cast %14 : vector<1x2x128xf32> to vector<2x128xf32>
    %16 = vector.shape_cast %13 : vector<2x128xf32> to vector<1x2x128xf32>
    tpu.vector_store %arg3[%c0_6, %c0_7, %c0_8], %16 {strides = array<i32>} : memref<1x2x128xf32, #tpu.memory_space<vmem>>, vector<1x2x128xf32>,
    return
  }
  func.func @transform_0(%arg0: i32) -> (i32, i32, i32) {
    %c0_i32 = arith.constant 0 : i32
    %c0_i32_0 = arith.constant 0 : i32
    %c0_i32_1 = arith.constant 0 : i32
    return %arg0, %c0_i32, %c0_i32_0 : i32, i32, i32
  }
  func.func @transform_1(%arg0: i32) -> (i32, i32) {
    %c0_i32 = arith.constant 0 : i32
    %c0_i32_0 = arith.constant 0 : i32
    %c0_i32_1 = arith.constant 0 : i32
    return %c0_i32, %c0_i32_0 : i32, i32
  }
  func.func @transform_2(%arg0: i32) -> (i32, i32, i32) {
    %c0_i32 = arith.constant 0 : i32
    %c0_i32_0 = arith.constant 0 : i32
    %c0_i32_1 = arith.constant 0 : i32
    return %arg0, %c0_i32, %c0_i32_0 : i32, i32, i32
  }
}

</mosaic_0001>

<bundles_post_ra>
// kernel: tpu_custom_call.1
= control target key start
LH: loop header
LB: loop body
LE: loop exit
PB: predicated region body
PF: predicated region fallthrough
CT: control target
= control target key end

     0   :  { %7 = vsyncpa [#allocation3], 0  ;;  %s601_s0 = inlined_call_operand.hbm [shape: f32[2,2,128], index: 0, kind: input, shape index: {}]   ;;  %s602_s1 = inlined_call_operand.vmem [shape: f32[2,128], index: 1, kind: input, shape index: {}]   ;;  %s603_s2 = inlined_call_operand.hbm [shape: f32[2,2,128], index: 2, kind: output, shape index: {}]  }
   0x1   :  { %9 = vsyncpa [#allocation3 + $0x1], 0 }
   0x2   :  { %10 = vsyncpa [#allocation4], 0 }
   0x3   :  { %12 = vsyncpa [#allocation4 + $0x1], 0  ;;  %s437_s9 = smov 0   ;;  %s439_s10 = smov 0  }
   0x4   :  { %s441_s11 = smov 0   ;;  %s443_s12 = smov 0  }
   0x5 LB: > { %s458_s13 = sadd.s32 4294967295, %s418_s12   ;;  %s262_s14 = sadd.s32 4294967294, %s418_s12   ;;  %s418_s12 = sphi %s443_s12, %s618_s12   ;;  %s414_s11 = sphi %s441_s11, %s617_s11   ;;  %s410_s10 = sphi %s439_s10, %s616_s10   ;;  %s406_s9 = sphi %s437_s9, %s615_s9  }
   0x6   : > { %s462_s15 = sadd.s32 1, %s418_s12   ;;  %s25_s16 = sadd.s32 1, %s414_s11 }
   0x7   : > { %s22_s17 = ssub.s32 %s418_s12, %s462_s15  ;;  %p32_p0 = scmp.ne.s32.totalorder %s414_s11, %s410_s10 }
   0x8   : > { %p23_p1 = scmp.eq.s32.totalorder %s22_s17, 0  ;;  %p33_p2 = scmp.eq.s32.totalorder %s418_s12, 0 }
   0x9   : > { %p38_p3 = scmp.ne.s32.totalorder %s410_s10, %s406_s9  ;;  %p39_p4 = scmp.eq.s32.totalorder %s458_s13, 0 }
   0xa   : > { %s474_s18 = scalar_select %p23_p1, %s414_s11, %s25_s16  }
   0xb   : > { %p476_p5 = por %p33_p2, %p32_p0  ;;  %p480_p6 = por %p39_p4, %p38_p3 }
   0xc   : > { %p83_p7 = scmp.eq.s32.totalorder %s458_s13, 1  ;;  %p89_p8 = scmp.eq.s32.totalorder %s262_s14, 1 }
   0xd   : > { %p286_p10 = scmp.lt.s32.totalorder %s418_s12, 2  ;;  %s112_s23 = sand.u32 1, %s414_s11  }
   0xe   : > { %p487_p11 = por %p83_p7, %p32_p0  ;;  %p491_p12 = por %p89_p8, %p38_p3 }
   0xf   : > { %s266_s24 = sshll.u32 %s418_s12, 5  ;;  %s265_s25 = sshll.u32 %s112_s23, 1 }
  0x10   : > { %s607_s21 = scalar_select %p487_p11, 1, 0 }
  0x11   : > { %s608_s22 = scalar_select %p491_p12, 1, 0 }
  0x12   : > { %s500_s28 = scalar_lea.hbm %s601_s0, %s266_s24  ;;  %s116_s29 = scalar_lea.vmem [#allocation2], %s265_s25 }
  0x13   : > { %s123_s30 = sshll.u32 %s116_s29, 4  ;;  %p504_p13 = pnand %p286_p10, %p476_p5  ;;  %s508_s30 = int_to_ptr.vmem [resolvable:$true] %s123_s30 }
  0x14   : > { %s113_s4 = scalar_lea.sflag [#allocation3], %s112_s23  ;;  %s322_s5 = scalar_lea.hbm %s500_s28, 32 }
  0x15   : > { %p323_p2 = scmp.ne.s32.totalorder %s500_s28, %s322_s5  ;;  %p324_p3 = pneg %p504_p13 }
  0x16   : > { %s327_s8 = scalar_lea.hbm %s601_s0, 64  ;;  %p328_p5 = scmp.lt.u32.totalorder %s500_s28, %s601_s0 }
  0x17   : > { %p325_p4 = pnand %p324_p3, %p323_p2  ;;  %p329_p8 = scmp.lt.u32.totalorder %s327_s8, %s322_s5 }
  0x18   : > { %p331_p9 = scmp.lt.u32.totalorder %s322_s5, %s500_s28 }
  0x19   : > { %p326_p7 = pneg %p325_p4  ;;  %p330_p10 = por %p329_p8, %p328_p5 }
  0x1b   : > { %p332_p0 = por %p331_p9, %p330_p10 }
  0x1d   : > { %p333_p1 = pnand %p332_p0, %p326_p7 }
  0x1f   : > { %336 = shalt.err (!%p333_p1)
}
  0x20   : > { %s337_s17 = scalar_lea.vmem %s508_s30, 32  ;;  %s420_s19 = smov [#allocation2]  }
  0x21   : > { %p338_p2 = scmp.ne.s32.totalorder %s508_s30, %s337_s17  ;;  %s342_s23 = sshll.u32 %s420_s19, 4  ;;  %s343_s23 = int_to_ptr.vmem [resolvable:$false] %s342_s23 }
  0x22   : > { %s344_s24 = scalar_lea.vmem %s343_s23, 64  ;;  %p345_p11 = scmp.lt.s32.totalorder %s508_s30, %s343_s23 }
  0x23   : > { %p340_p4 = pnand %p338_p2, %p324_p3  ;;  %p346_p5 = scmp.lt.s32.totalorder %s344_s24, %s337_s17 }
  0x25   : > { %p341_p12 = pneg %p340_p4  ;;  %p347_p8 = por %p346_p5, %p345_p11 }
  0x27   : > { %p348_p9 = pnand %p347_p8, %p341_p12 }
  0x29   : > { %351 = shalt.err (!%p348_p9)
}
  0x2a   : > { %281 = dma.hbm_to_vmem [thread:$0]  (!%p504_p13), %s500_s28, 32, %s508_s30, %s113_s4  }
  0x2b   : > { %p610_p0 = scmp.lt.s32.totalorder %s418_s12, 3  ;;  %p611_p1 = scmp.ge.s32.totalorder %s418_s12, 1 }
  0x2d   : > { %p129_p3 = pnand %p611_p1, %p610_p0 }
  0x2e   : > { %s542_s25 = sand.u32 (!%p129_p3), 1, %s410_s10  }
  0x2f   : > { %132 = sbr.rel (%p129_p3) target bundleno = 243 (0xf3), region = 28  ;;  %s268_s26 = sshll.u32 (!%p129_p3), %s542_s25, 1 }
  0x30   : > { %s135_s27 = scalar_lea.sflag (!%p129_p3), [#allocation3], %s542_s25  ;;  %s138_s29 = scalar_lea.vmem (!%p129_p3), [#allocation2], %s268_s26 }
  0x36   : > { %397 = dma.done.wait (%p480_p6), %s135_s27, 32  }
  0x37   : > { %399 = vsyncadd (%p480_p6), %s135_s27, 4294967264  ;;  %v159_v0 = vld [vmem:[%s138_s29] sm:$0x3]  ;;  %vm161_vm0 = vcmask 1041408   ;;  %s271_s30 = sshll.u32 %s458_s13, 5  ;;  %s158_s3 = scalar_lea.vmem [#allocation5], %s268_s26 }
  0x38   : > { %v160_v1 = vmul.f32 %v159_v0, %v159_v0  ;;  %v174_v12 = vld [vmem:[%s602_s1] sm:$0x3]  ;;  %s192_s4 = sshll.u32 %s158_s3, 4  ;;  %s557_s7 = scalar_lea.hbm %s603_s2, %s271_s30  ;;  %s559_s4 = int_to_ptr.vmem [resolvable:$true] %s192_s4 }
  0x39   : > { %v175_v13 = vmul.f32 %v174_v12, %v159_v0  ;;  %s179_s8 = scalar_lea.sflag [#allocation4], %s542_s25  ;;  %s352_s14 = scalar_lea.vmem %s559_s4, 32 }
  0x3a   : > { %v162_v2 = vsel %vm161_vm0, %v160_v1, 0.0  ;;  %p353_p6 = scmp.ne.s32.totalorder %s559_s4, %s352_s14  ;;  %p612_p11 = scmp.ne.s32.totalorder %s607_s21, 0 }
  0x3b   : > { %163 = vadd.xlane.f32.xlu0 %v162_v2  ;;  %s421_s13 = smov [#allocation5]  }
  0x3c   : > { %p354_p12 = pnand %p353_p6, %p612_p11  ;;  %s356_s16 = sshll.u32 %s421_s13, 4  ;;  %s357_s16 = int_to_ptr.vmem [resolvable:$false] %s356_s16 }
  0x3d   : > { %s358_s17 = scalar_lea.vmem %s357_s16, 64  ;;  %p359_p7 = scmp.lt.s32.totalorder %s559_s4, %s357_s16 }
  0x3e   : > { %p355_p13 = pneg %p354_p12  ;;  %p360_p10 = scmp.lt.s32.totalorder %s358_s17, %s352_s14 }
  0x40   : > { %p361_p2 = por %p360_p10, %p359_p7 }
  0x42   : > { %p362_p4 = pnand %p361_p2, %p355_p13 }
  0xc8   : > { %v164_v3 = vpop.xlane.xlu0 %163 }
  0xc9   : > { %v165_v4 = vsel %vm161_vm0, %v164_v3, 0.0 }
  0xca   : > { %v166_v5 = vrot.slane %v165_v4, 4 }
  0xcc   : > { %v167_v6 = vadd.f32 %v166_v5, %v165_v4 }
  0xce   : > { %v168_v7 = vrot.slane %v167_v6, 2 }
  0xd0   : > { %v169_v8 = vadd.f32 %v168_v7, %v167_v6 }
  0xd2   : > { %v170_v9 = vrot.slane %v169_v8, 1 }
  0xd4   : > { %v171_v10 = vadd.f32 %v170_v9, %v169_v8 }
  0xd6   : > { %v172_v11 = vmul.f32 0.00390625, %v171_v10 }
  0xd8   : > { %320 = vrsqrt.f32 %v172_v11 }
  0xe2   : > { %v321_v14 = vpop.eup %320 }
  0xe3   : > { %v176_v15 = vmul.f32 %v321_v14, %v175_v13 }
  0xe5   : > { %177 = vst [vmem:[%s158_s3] sm:$0x3] %v176_v15 }
  0xe6   : > { %365 = shalt.err (!%p362_p4)
}
  0xe7   : > { %s366_s19 = scalar_lea.hbm %s557_s7, 32  ;;  %s370_s25 = scalar_lea.hbm %s603_s2, 64 }
  0xe8   : > { %p367_p5 = scmp.ne.s32.totalorder %s557_s7, %s366_s19  ;;  %p371_p0 = scmp.lt.u32.totalorder %s557_s7, %s603_s2 }
  0xe9   : > { %p372_p1 = scmp.lt.u32.totalorder %s370_s25, %s366_s19  ;;  %p374_p6 = scmp.lt.u32.totalorder %s366_s19, %s557_s7 }
  0xea   : > { %p368_p8 = pnand %p367_p5, %p612_p11 }
  0xeb   : > { %p373_p3 = por %p372_p1, %p371_p0 }
  0xec   : > { %p369_p9 = pneg %p368_p8 }
  0xed   : > { %p375_p12 = por %p374_p6, %p373_p3 }
  0xef   : > { %p376_p13 = pnand %p375_p12, %p369_p9 }
  0xf1   : > { %379 = shalt.err (!%p376_p13)
}
  0xf2   : > { %276 = dma.vmem_to_hbm [thread:$0]  (%p612_p11), %s559_s4, 32, %s557_s7, %s179_s8  }
  0xf3 PF: > { %s204_s29 = sand.u32 1, %s406_s9   ;;  %p613_p7 = scmp.ne.s32.totalorder %s608_s22, 0 }
  0xf4   : > { %p614_p10 = scmp.ge.s32.totalorder %s418_s12, 2  ;;  %s205_s20 = scalar_lea.sflag [#allocation4], %s204_s29 }
  0xf6   : > { %p283_p2 = pnand %p614_p10, %p613_p7 }
  0xf8   : > { %401 = dma.done.wait (!%p283_p2), %s205_s20, 32  }
  0xf9   : > { %403 = vsyncadd (!%p283_p2), %s205_s20, 4294967264  ;;  %p15_p4 = scmp.ge.s32.totalorder %s462_s15, 4   ;;  %s615_s9 = smov %s410_s10 }
  0xfa   : > { %s616_s10 = smov %s414_s11  ;;  %s617_s11 = smov %s474_s18 }
  0xfb   : > { %s618_s12 = smov %s462_s15  ;;  %17 = sbr.rel (!%p15_p4) target bundleno = 5 (0x5), region = 73 }
 0x102   :  { %210 = vsyncpa [#allocation3], 1 }
 0x103   :  { %212 = vsyncpa [#allocation3 + $0x1], 1 }
 0x104   :  { %213 = vsyncpa [#allocation4], 1 }
 0x105   :  { %215 = vsyncpa [#allocation4 + $0x1], 1 }

</bundles_post_ra>
